<compile_context>
chip_gen: v6e
topology: v6e:2x2x1
jax: 0.10.0
libtpu: 0.0.40
codegen_flags: <defaults>
</compile_context>

<pallas_src>
import math
from functools import partial

import jax
import jax.numpy as jnp
from jax.experimental import pallas as pl
from jax.experimental.pallas import tpu as pltpu

_NEG_BIG = -1e30  # logit bias for padded class columns; exp(_NEG_BIG - max) -> 0


# ---------------------------------------------------------------------------
# Kernel: one row tile  ->  log_softmax(x_tile @ W^T + b)
# ---------------------------------------------------------------------------
def _classifier_kernel(x_ref, w_ref, b_ref, o_ref):
    # Linear: [tm, H] @ [H, Cp]  (f32 accumulate on the MXU)
    z = jnp.dot(x_ref[...], w_ref[...], preferred_element_type=jnp.float32)
    z = z + b_ref[...]                       # padded classes carry -1e30 bias
    # numerically stable row-wise log-softmax, fused (no extra HBM pass)
    m = jnp.max(z, axis=-1, keepdims=True)
    s = z - m
    lse = jnp.log(jnp.sum(jnp.exp(s), axis=-1, keepdims=True))
    o_ref[...] = (s - lse).astype(o_ref.dtype)


# ---------------------------------------------------------------------------
# One-time parameter preparation (hoisted out of the per-call path)
# ---------------------------------------------------------------------------
def prepare_classifier_params(weight, bias, *, compute_dtype=None):
    """Pad nn.Linear params once for the kernel.

    weight: [n_classes, n_hidden]  (PyTorch nn.Linear layout)
    bias:   [n_classes]
    Returns (w_t, b_p, n_classes):
      w_t [n_hidden, c_pad] with classes on lanes (c_pad = round_up(C, 128)),
      b_p [1, c_pad] f32 with padded columns set to -1e30.
    """
    n_classes, n_hidden = weight.shape
    if compute_dtype is None:
        compute_dtype = weight.dtype
    c_pad = pl.cdiv(n_classes, 128) * 128
    w_t = (jnp.zeros((n_hidden, c_pad), compute_dtype)
           .at[:, :n_classes].set(weight.T.astype(compute_dtype)))
    b_p = (jnp.full((1, c_pad), _NEG_BIG, jnp.float32)
           .at[0, :n_classes].set(bias.astype(jnp.float32)))
    return w_t, b_p, n_classes


def _choose_row_tile(n, row_tile):
    # Big tiles amortize the ~0.35us/step pipeline overhead, but keep >=4 grid
    # steps (2 per TensorCore) when n allows, so ("parallel",) can shard the
    # row axis across both v7x TCs.  No-op on v5e/v6e (single TC).
    quarter = -(-n // 4)              # cdiv(n, 4)
    quarter = -(-quarter // 8) * 8    # round up to a sublane multiple
    return max(8, min(row_tile, quarter))


# ---------------------------------------------------------------------------
# Forward: tiling / pallas_call plumbing
# ---------------------------------------------------------------------------
def classifier_forward(features, w_t, b_p, n_classes, *,
                       row_tile=512, out_dtype=None):
    """log_softmax(features @ W.T + b, axis=-1) using pre-padded params."""
    orig_shape = features.shape
    h = orig_shape[-1]
    c_pad = w_t.shape[1]
    if out_dtype is None:
        out_dtype = features.dtype

    # No upcast, no explicit N-pad copy: rows are independent, and any
    # out-of-bounds rows of a partial last block are dropped at writeback.
    x2 = features.reshape(-1, h)
    n = x2.shape[0]
    tm = _choose_row_tile(n, row_tile)
    grid = (pl.cdiv(n, tm),)

    out = pl.pallas_call(
        _classifier_kernel,
        out_shape=jax.ShapeDtypeStruct((n, c_pad), out_dtype),
        grid=grid,
        in_specs=[
            pl.BlockSpec((tm, h), lambda i: (i, 0)),      # streamed row tile
            pl.BlockSpec((h, c_pad), lambda i: (0, 0)),   # resident W^T (classes on lanes)
            pl.BlockSpec((1, c_pad), lambda i: (0, 0)),   # resident bias row
        ],
        out_specs=pl.BlockSpec((tm, c_pad), lambda i: (i, 0)),
        compiler_params=pltpu.CompilerParams(
            dimension_semantics=("parallel",)),           # v7x: both TensorCores
    )(x2, w_t, b_p)

    # Drop padded class columns.
    # TODO(synk): fuse the real downstream consumer (NLL loss / argmax) into
    # the kernel epilogue so only [tm, small] is written per tile.
    out = out[:, :n_classes]
    return out.reshape(*orig_shape[:-1], n_classes)


# ---------------------------------------------------------------------------
# Deterministic parameter construction (matches nn.Linear.reset_parameters bounds)
# ---------------------------------------------------------------------------
def build_params(key, n_hidden, n_classes):
    kw, kb = jax.random.split(key)
    bound = 1.0 / math.sqrt(n_hidden)
    w = jax.random.uniform(kw, (n_classes, n_hidden), jnp.float32, -bound, bound)
    b = jax.random.uniform(kb, (n_classes,), jnp.float32, -bound, bound)
    return w, b


if __name__ == "__main__":
    N_ROWS = 256        # rows (nodes / minibatch)
    N_HIDDEN = 32
    N_CLASSES = 10

    key = jax.random.PRNGKey(0)
    k_param, k_x = jax.random.split(key)

    weight, bias = build_params(k_param, N_HIDDEN, N_CLASSES)
    features = jax.random.normal(k_x, (N_ROWS, N_HIDDEN), jnp.float32)

    # Parameter padding done once, outside the per-call path.
    w_t, b_p, n_classes = prepare_classifier_params(weight, bias)

    fwd = jax.jit(partial(classifier_forward, n_classes=n_classes))
    out = fwd(features, w_t, b_p)
    jax.block_until_ready(out)

    # pure-JAX reference check
    ref = jax.nn.log_softmax(features @ weight.T + bias, axis=-1)
    assert out.shape == (N_ROWS, N_CLASSES)
    assert bool(jnp.all(jnp.isfinite(out)))
    assert bool(jnp.allclose(out, ref, atol=1e-5, rtol=1e-5))
    print("KERNEL_OK")
</pallas_src>

<mosaic_0001>
module attributes {stable_mosaic.version = 11 : i64} {
  func.func @_classifier_kernel(%arg0: i32, %arg1: memref<64x32xf32, #tpu.memory_space<vmem>>, %arg2: memref<32x128xf32, #tpu.memory_space<vmem>>, %arg3: memref<1x128xf32, #tpu.memory_space<vmem>>, %arg4: memref<64x128xf32, #tpu.memory_space<vmem>>) attributes {dimension_semantics = [#tpu.dimension_semantics<parallel>], iteration_bounds = array<i64: 4>, scalar_prefetch = 0 : i64, scratch_operands = 0 : i64, tpu.core_type = #tpu.core_type<tc>, window_params = [{transform_indices = @transform_0, window_bounds = array<i64: 64, 32>}, {pipeline_mode = #tpu.pipeline_mode<synchronous>, transform_indices = @transform_1, window_bounds = array<i64: 32, 128>}, {pipeline_mode = #tpu.pipeline_mode<synchronous>, transform_indices = @transform_2, window_bounds = array<i64: 1, 128>}, {transform_indices = @transform_3, window_bounds = array<i64: 64, 128>}]} {
    %c0 = arith.constant 0 : index
    %c0_0 = arith.constant 0 : index
    %0 = vector.load %arg1[%c0, %c0_0] : memref<64x32xf32, #tpu.memory_space<vmem>>, vector<64x32xf32>
    %c0_1 = arith.constant 0 : index
    %c0_2 = arith.constant 0 : index
    %1 = vector.load %arg2[%c0_1, %c0_2] : memref<32x128xf32, #tpu.memory_space<vmem>>, vector<32x128xf32>
    %cst = arith.constant dense<0.000000e+00> : vector<64x128xf32>
    %2 = tpu.matmul %0, %1, %cst {dimension_numbers = #tpu.dot_dimension_numbers<[1], [0], [0], [1], [0, 0, 1, 1], [], []>} : vector<64x32xf32>, vector<32x128xf32>, vector<64x128xf32> -> vector<64x128xf32>
    %c0_3 = arith.constant 0 : index
    %c0_4 = arith.constant 0 : index
    %3 = vector.load %arg3[%c0_3, %c0_4] : memref<1x128xf32, #tpu.memory_space<vmem>>, vector<1x128xf32>
    %4 = vector.broadcast %3 : vector<1x128xf32> to vector<64x128xf32>
    %5 = arith.addf %2, %4 : vector<64x128xf32>
    %cst_5 = arith.constant dense<0xFF800000> : vector<64xf32>
    %6 = vector.multi_reduction <maximumf>, %5, %cst_5 [1] : vector<64x128xf32> to vector<64xf32>
    %7 = vector.shape_cast %6 : vector<64xf32> to vector<64x1xf32>
    %8 = vector.broadcast %7 : vector<64x1xf32> to vector<64x128xf32>
    %9 = arith.subf %5, %8 : vector<64x128xf32>
    %10 = math.exp %9 : vector<64x128xf32>
    %cst_6 = arith.constant dense<0.000000e+00> : vector<64xf32>
    %11 = vector.multi_reduction <add>, %10, %cst_6 [1] : vector<64x128xf32> to vector<64xf32>
    %12 = vector.shape_cast %11 : vector<64xf32> to vector<64x1xf32>
    %13 = math.log %12 : vector<64x1xf32>
    %14 = vector.broadcast %13 : vector<64x1xf32> to vector<64x128xf32>
    %15 = arith.subf %9, %14 : vector<64x128xf32>
    %c0_7 = arith.constant 0 : index
    %c0_8 = arith.constant 0 : index
    %16 = vector.load %arg4[%c0_7, %c0_8] : memref<64x128xf32, #tpu.memory_space<vmem>>, vector<64x128xf32>
    tpu.vector_store %arg4[%c0_7, %c0_8], %15 {strides = array<i32>} : memref<64x128xf32, #tpu.memory_space<vmem>>, vector<64x128xf32>,
    return
  }
  func.func @transform_0(%arg0: i32) -> (i32, i32) {
    %c0_i32 = arith.constant 0 : i32
    %c0_i32_0 = arith.constant 0 : i32
    return %arg0, %c0_i32 : i32, i32
  }
  func.func @transform_1(%arg0: i32) -> (i32, i32) {
    %c0_i32 = arith.constant 0 : i32
    %c0_i32_0 = arith.constant 0 : i32
    %c0_i32_1 = arith.constant 0 : i32
    return %c0_i32, %c0_i32_0 : i32, i32
  }
  func.func @transform_2(%arg0: i32) -> (i32, i32) {
    %c0_i32 = arith.constant 0 : i32
    %c0_i32_0 = arith.constant 0 : i32
    %c0_i32_1 = arith.constant 0 : i32
    return %c0_i32, %c0_i32_0 : i32, i32
  }
  func.func @transform_3(%arg0: i32) -> (i32, i32) {
    %c0_i32 = arith.constant 0 : i32
    %c0_i32_0 = arith.constant 0 : i32
    return %arg0, %c0_i32 : i32, i32
  }
}

</mosaic_0001>

<bundles_post_ra>
// kernel: classifier_forward.1
= control target key start
LH: loop header
LB: loop body
LE: loop exit
PB: predicated region body
PF: predicated region fallthrough
CT: control target
= control target key end

     0   :  { %s595_s12 = smov 0   ;;  %s684_s0 = inlined_call_operand.vmem [shape: f32[256,32], index: 0, kind: input, shape index: {}]   ;;  %s685_s1 = inlined_call_operand.vmem [shape: f32[32,128], index: 1, kind: input, shape index: {}]   ;;  %s686_s2 = inlined_call_operand.vmem [shape: f32[1,128], index: 2, kind: input, shape index: {}]   ;;  %s687_s3 = inlined_call_operand.vmem [shape: f32[256,128], index: 3, kind: output, shape index: {}]  }
   0x1 LB: > { %s467_s13 = sadd.s32 4294967295, %s573_s12   ;;  %p471_p0 = scmp.ge.s32.totalorder %s573_s12, 1  ;;  %s573_s12 = sphi %s595_s12, %s13_s12  }
   0x2   : > { %p138_p1 = scmp.lt.s32.totalorder %s573_s12, 5 }
   0x4   : > { %p139_p2 = pnand %p471_p0, %p138_p1 }
   0x5   : > { %s472_s18 = sshll.u32 (!%p139_p2), %s467_s13, 3 }
   0x6   : > { %142 = sbr.rel (%p139_p2) target bundleno = 546 (0x222), region = 32  ;;  %p163_p3 = scmp.lt.s32.totalorder (!%p139_p2), %s472_s18, 31 }
   0xb   : > { %v185_v0 = vld [vmem:[%s685_s1 + $0x18] sm:$0xff]  ;;  %v184_v1 = vld [vmem:[%s685_s1 + $0x10] sm:$0xff]  ;;  %v183_v2 = vld [vmem:[%s685_s1 + $0x8] sm:$0xff]  ;;  %s689_s18 = smov (!%p163_p3, %s472_s18), 31  ;;  %vm193_vm0 = vcmask 261120  }
   0xc   : > { %499 = vmatprep.subr.mxu0 %v185_v0  ;;  %519 = vmatprep.subr.mxu1 %v185_v0  ;;  %v182_v3 = vld [vmem:[%s685_s1] sm:$0xff]  ;;  %s473_s23 = sshll.u32 %s689_s18, 3 }
   0xd   : > { %500 = vmatpush3.msra.mxu0 %v185_v0  ;;  %523 = vmatpush3.msra.mxu1 %v185_v0  ;;  %s166_s26 = scalar_lea.vmem %s684_s0, %s473_s23  ;;  %v476_v12 = vld [vmem:[%s686_s2] ss:$0 sm:$0xff]  ;;  %s663_s4 = scalar_lea.vmem %s687_s3, %s473_s23 }
   0xe   : > { %501 = vmatprep.subr.mxu0 %v184_v1  ;;  %520 = vmatprep.subr.mxu1 %v184_v1  ;;  %v174_v4 = vld [vmem:[%s166_s26] sm:$0xff]  ;;  %v175_v6 = vld [vmem:[%s166_s26 + $0x8] sm:$0xff]  ;;  %v176_v8 = vld [vmem:[%s166_s26 + $0x10] sm:$0xff] }
   0xf   : > { %502 = vmatpush3.msra.mxu0 %v184_v1  ;;  %524 = vmatpush3.msra.mxu1 %v184_v1  ;;  %v178_v5 = vld [vmem:[%s166_s26 + $0x20] sm:$0xff]  ;;  %v179_v7 = vld [vmem:[%s166_s26 + $0x28] sm:$0xff]  ;;  %v180_v9 = vld [vmem:[%s166_s26 + $0x30] sm:$0xff] }
  0x10   : > { %503 = vmatprep.subr.mxu0 %v183_v2  ;;  %521 = vmatprep.subr.mxu1 %v183_v2  ;;  %v177_v10 = vld [vmem:[%s166_s26 + $0x18] sm:$0xff] }
  0x11   : > { %504 = vmatpush3.msra.mxu0 %v183_v2  ;;  %525 = vmatpush3.msra.mxu1 %v183_v2  ;;  %v181_v11 = vld [vmem:[%s166_s26 + $0x38] sm:$0xff] }
  0x12   : > { %505 = vmatprep.subr.mxu0 %v182_v3  ;;  %522 = vmatprep.subr.mxu1 %v182_v3 }
  0x13   : > { %506 = vmatpush3.msra.mxu0 %v182_v3  ;;  %526 = vmatpush3.msra.mxu1 %v182_v3 }
  0x14   : > { %507 = vmatprep.mubr.msk.f32.mxu0 %vm193_vm0, %v174_v4  ;;  %513 = vmatprep.mubr.msk.f32.mxu1 %vm193_vm0, %v178_v5 }
  0x15   : > { %508 = vmatmul.mubr.msk.f32.vlgmr.msra.gmra.mxu0 %vm193_vm0, %v175_v6  ;;  %514 = vmatmul.mubr.msk.f32.vlgmr.msra.gmra.mxu1 %vm193_vm0, %v179_v7 }
  0x16   : > { %510 = vmatprep.mubr.msk.f32.mxu0 %vm193_vm0, %v176_v8  ;;  %516 = vmatprep.mubr.msk.f32.mxu1 %vm193_vm0, %v180_v9 }
  0x19   : > { %511 = vmatmul.mubr.msk.f32.gmra.mxu0 %vm193_vm0, %v177_v10  ;;  %517 = vmatmul.mubr.msk.f32.gmra.mxu1 %vm193_vm0, %v181_v11 }
  0xd5   : > { %v509_v13 = vpop.f32.mrf.mxu0  ;;  %v515_v14 = vpop.f32.mrf.mxu1 }
  0xd6   : > { %v290_v15 = vadd.f32 %v509_v13, %v476_v12  ;;  %v310_v16 = vadd.f32 %v515_v14, %v476_v12 }
  0xd7   : > { %v284_v17 = vpop.f32.mrf.mxu0  ;;  %v304_v18 = vpop.f32.mrf.mxu1 }
  0xd8   : > { %333 = vmax.xlane.f32.xlu1 %v310_v16  ;;  %325 = vmax.xlane.f32.xlu0 %v290_v15  ;;  %v285_v21 = vadd.f32 %v476_v12, %v284_v17  ;;  %v305_v26 = vadd.f32 %v476_v12, %v304_v18 }
  0xd9   : > { %v512_v19 = vpop.f32.mrf.mxu0  ;;  %v518_v20 = vpop.f32.mrf.mxu1 }
  0xda   : > { %v300_v22 = vadd.f32 %v512_v19, %v476_v12  ;;  %v320_v27 = vadd.f32 %v518_v20, %v476_v12 }
  0xdb   : > { %v294_v23 = vpop.f32.mrf.mxu0  ;;  %v314_v25 = vpop.f32.mrf.mxu1 }
  0xdc   : > { %329 = vmax.xlane.f32.xlu1 %v300_v22  ;;  %323 = vmax.xlane.f32.xlu0 %v285_v21  ;;  %v295_v24 = vadd.f32 %v476_v12, %v294_v23  ;;  %v315_v28 = vadd.f32 %v476_v12, %v314_v25 }
  0xe0   : > { %327 = vmax.xlane.f32.xlu1 %v295_v24  ;;  %331 = vmax.xlane.f32.xlu0 %v305_v26 }
  0xe4   : > { %337 = vmax.xlane.f32.xlu1 %v320_v27  ;;  %335 = vmax.xlane.f32.xlu0 %v315_v28 }
 0x161   : > { %v334_v29 = vpop.xlane.xlu1 %333  ;;  %v326_v30 = vpop.xlane.xlu0 %325 }
 0x162   : > { %v634_v31 = vsub.f32 %v310_v16, %v334_v29  ;;  %v636_v32 = vsub.f32 %v290_v15, %v326_v30 }
 0x164   : > { %v349_v33 = vmul.f32 1.442695, %v636_v32  ;;  %v357_v36 = vmul.f32 1.442695, %v634_v31 }
 0x165   : > { %v330_v34 = vpop.xlane.xlu1 %329  ;;  %v324_v35 = vpop.xlane.xlu0 %323 }
 0x166   : > { %v640_v37 = vsub.f32 %v300_v22, %v330_v34  ;;  %v642_v38 = vsub.f32 %v285_v21, %v324_v35  ;;  %535 = vpow2.f32 %v349_v33 }
 0x167   : > { %537 = vpow2.f32 %v357_v36 }
 0x168   : > { %v347_v39 = vmul.f32 1.442695, %v642_v38  ;;  %v353_v42 = vmul.f32 1.442695, %v640_v37 }
 0x169   : > { %v328_v40 = vpop.xlane.xlu1 %327  ;;  %v332_v41 = vpop.xlane.xlu0 %331 }
 0x16a   : > { %v646_v43 = vsub.f32 %v305_v26, %v332_v41  ;;  %539 = vpow2.f32 %v347_v39  ;;  %v648_v44 = vsub.f32 %v295_v24, %v328_v40 }
 0x16b   : > { %541 = vpow2.f32 %v353_v42 }
 0x16c   : > { %v355_v45 = vmul.f32 1.442695, %v646_v43  ;;  %v351_v49 = vmul.f32 1.442695, %v648_v44 }
 0x16d   : > { %v338_v46 = vpop.xlane.xlu1 %337  ;;  %v336_v47 = vpop.xlane.xlu0 %335 }
 0x16e   : > { %v651_v48 = vsub.f32 %v320_v27, %v338_v46  ;;  %543 = vpow2.f32 %v355_v45  ;;  %v654_v50 = vsub.f32 %v315_v28, %v336_v47 }
 0x170   : > { %v361_v51 = vmul.f32 1.442695, %v651_v48  ;;  %v359_v52 = vmul.f32 1.442695, %v654_v50 }
 0x172   : > { %545 = vpow2.f32 %v361_v51 }
 0x173   : > { %547 = vpow2.f32 %v351_v49  ;;  %v536_v53 = vpop.eup %535 }
 0x174   : > { %365 = vadd.xlane.f32.xlu1 %v536_v53  ;;  %v538_v54 = vpop.eup %537  ;;  %549 = vpow2.f32 %v359_v52 }
 0x177   : > { %v540_v55 = vpop.eup %539 }
 0x178   : > { %373 = vadd.xlane.f32.xlu1 %v538_v54  ;;  %363 = vadd.xlane.f32.xlu0 %v540_v55  ;;  %v542_v56 = vpop.eup %541 }
 0x17b   : > { %v544_v57 = vpop.eup %543 }
 0x17c   : > { %369 = vadd.xlane.f32.xlu1 %v542_v56  ;;  %371 = vadd.xlane.f32.xlu0 %v544_v57 }
 0x17f   : > { %v546_v58 = vpop.eup %545 }
 0x180   : > { %v548_v59 = vpop.eup %547  ;;  %377 = vadd.xlane.f32.xlu1 %v546_v58 }
 0x181   : > { %367 = vadd.xlane.f32.xlu0 %v548_v59  ;;  %v550_v60 = vpop.eup %549 }
 0x185   : > { %375 = vadd.xlane.f32.xlu0 %v550_v60 }
 0x1fd   : > { %v366_v61 = vpop.xlane.xlu1 %365 }
 0x1fe   : > { %551 = vlog2.f32 %v366_v61 }
 0x201   : > { %v374_v62 = vpop.xlane.xlu1 %373  ;;  %v364_v63 = vpop.xlane.xlu0 %363 }
 0x202   : > { %553 = vlog2.f32 %v374_v62 }
 0x203   : > { %555 = vlog2.f32 %v364_v63 }
 0x205   : > { %v370_v0 = vpop.xlane.xlu1 %369  ;;  %v372_v1 = vpop.xlane.xlu0 %371 }
 0x206   : > { %557 = vlog2.f32 %v370_v0 }
 0x207   : > { %559 = vlog2.f32 %v372_v1 }
 0x209   : > { %v378_v2 = vpop.xlane.xlu1 %377 }
 0x20a   : > { %v368_v3 = vpop.xlane.xlu0 %367  ;;  %561 = vlog2.f32 %v378_v2 }
 0x20b   : > { %v552_v4 = vpop.eup %551  ;;  %563 = vlog2.f32 %v368_v3 }
 0x20c   : > { %v382_v5 = vmul.f32 0.6931472, %v552_v4 }
 0x20e   : > { %v376_v6 = vpop.xlane.xlu0 %375  ;;  %v396_v7 = vsub.f32 %v636_v32, %v382_v5 }
 0x20f   : > { %565 = vlog2.f32 %v376_v6  ;;  %v554_v8 = vpop.eup %553 }
 0x210   : > { %v556_v9 = vpop.eup %555  ;;  %404 = vst [vmem:[%s663_s4 + $0x8] sm:$0xff] %v396_v7  ;;  %v390_v10 = vmul.f32 0.6931472, %v554_v8 }
 0x211   : > { %v380_v11 = vmul.f32 0.6931472, %v556_v9 }
 0x212   : > { %v400_v12 = vsub.f32 %v634_v31, %v390_v10 }
 0x213   : > { %v558_v13 = vpop.eup %557  ;;  %v395_v14 = vsub.f32 %v642_v38, %v380_v11 }
 0x214   : > { %v560_v15 = vpop.eup %559  ;;  %408 = vst [vmem:[%s663_s4 + $0x28] sm:$0xff] %v400_v12  ;;  %v386_v16 = vmul.f32 0.6931472, %v558_v13 }
 0x215   : > { %403 = vst [vmem:[%s663_s4] sm:$0xff] %v395_v14  ;;  %v388_v17 = vmul.f32 0.6931472, %v560_v15 }
 0x216   : > { %v398_v18 = vsub.f32 %v640_v37, %v386_v16 }
 0x217   : > { %v562_v19 = vpop.eup %561  ;;  %v399_v20 = vsub.f32 %v646_v43, %v388_v17 }
 0x218   : > { %v564_v21 = vpop.eup %563  ;;  %406 = vst [vmem:[%s663_s4 + $0x18] sm:$0xff] %v398_v18  ;;  %v394_v22 = vmul.f32 0.6931472, %v562_v19 }
 0x219   : > { %407 = vst [vmem:[%s663_s4 + $0x20] sm:$0xff] %v399_v20  ;;  %v384_v23 = vmul.f32 0.6931472, %v564_v21 }
 0x21a   : > { %v402_v24 = vsub.f32 %v651_v48, %v394_v22 }
 0x21b   : > { %v397_v26 = vsub.f32 %v648_v44, %v384_v23 }
 0x21c   : > { %v566_v25 = vpop.eup %565  ;;  %410 = vst [vmem:[%s663_s4 + $0x38] sm:$0xff] %v402_v24 }
 0x21d   : > { %v392_v27 = vmul.f32 0.6931472, %v566_v25  ;;  %405 = vst [vmem:[%s663_s4 + $0x10] sm:$0xff] %v397_v26 }
 0x21f   : > { %v401_v28 = vsub.f32 %v654_v50, %v392_v27 }
 0x221   : > { %409 = vst [vmem:[%s663_s4 + $0x30] sm:$0xff] %v401_v28 }
 0x222 PF: > { %s13_s12 = sadd.s32 1, %s573_s12  }
 0x223   : > { %p10_p4 = scmp.ge.s32.totalorder %s13_s12, 6  }
 0x225   :  { %12 = sbr.rel (!%p10_p4) target bundleno = 1 (0x1), region = 62 }

</bundles_post_ra>
